<compile_context>
chip_gen: v5e
topology: v5e:2x2
jax: 0.10.0
libtpu: 0.0.40
codegen_flags: <defaults>
</compile_context>

<pallas_src>
import functools

import jax
import jax.numpy as jnp
from jax.experimental import pallas as pl
from jax.experimental.pallas import tpu as pltpu


def _round_up(x, m):
    return ((x + m - 1) // m) * m


def channel_attention_kernel(x_ref, w1t_ref, w2t_ref, o_ref, sum_ref, max_ref,
                             *, hw_total, hw_tile, masked):
    # x_ref:   (nb, C, hw_tile)  native dtype
    # w1t_ref: (C, Ch)  f32      w2t_ref: (Ch, C)  f32
    # o_ref:   (nb, C)           sum_ref/max_ref: (nb, C) f32 scratch
    h = pl.program_id(1)

    @pl.when(h == 0)
    def _():
        sum_ref[...] = jnp.zeros_like(sum_ref)
        max_ref[...] = jnp.full_like(max_ref, -jnp.inf)

    x = x_ref[...].astype(jnp.float32)                 # upcast in-register only
    if masked:
        # Ragged last HW tile: ignore lanes past the true spatial extent.
        lane = jax.lax.broadcasted_iota(jnp.int32, x.shape, dimension=2)
        valid = lane < (hw_total - h * hw_tile)
        x_sum = jnp.where(valid, x, 0.0)
        x_max = jnp.where(valid, x, -jnp.inf)
    else:
        x_sum = x
        x_max = x

    sum_ref[...] += jnp.sum(x_sum, axis=-1)            # (nb, C) f32 accumulate
    max_ref[...] = jnp.maximum(max_ref[...], jnp.max(x_max, axis=-1))

    @pl.when(h == pl.num_programs(1) - 1)
    def _():
        nb = sum_ref.shape[0]
        avg = sum_ref[...] * (1.0 / hw_total)          # (nb, C)
        mx = max_ref[...]                              # (nb, C)
        # Shared MLP applied once to the stacked (2*nb, C) activations.
        a = jnp.concatenate([avg, mx], axis=0)         # (2*nb, C)
        hid = jnp.dot(a, w1t_ref[...], preferred_element_type=jnp.float32)
        hid = jnp.maximum(hid, 0.0)                    # ReLU
        proj = jnp.dot(hid, w2t_ref[...], preferred_element_type=jnp.float32)
        o_ref[...] = jax.nn.sigmoid(proj[:nb] + proj[nb:]).astype(o_ref.dtype)


def _chip_budget():
    """Return (scoped-VMEM budget we allow ourselves, assumed #TensorCores)."""
    vmem_cap = 128 << 20
    try:
        info = pltpu.get_tpu_info()
        vmem_cap = int(getattr(info, "vmem_capacity_bytes", vmem_cap))
    except Exception:
        pass
    if vmem_cap <= (64 << 20):
        # v7x-class: 64 MiB VMEM per TC, 2 TCs/chip -> leave compiler headroom.
        return 40 << 20, 2
    # v5e / v6e: 128 MiB VMEM, 1 TC.
    return 96 << 20, 1


def channel_attention(x_nchw, w1, w2, *, target_block_bytes=8 << 20,
                      _max_block_bytes=None):
    """x_nchw: (N, C, H, W); w1: (C//r, C); w2: (C, C//r). Returns (N, C, 1, 1)."""
    N, C, H, W = x_nchw.shape
    Ch = w1.shape[0]
    HW = H * W

    # Stream x in its native dtype (no extra full-tensor cast pass in HBM).
    x_flat = x_nchw.reshape(N, C, HW)
    itemsize = jnp.dtype(x_flat.dtype).itemsize
    out_dtype = x_flat.dtype if jnp.issubdtype(x_flat.dtype, jnp.floating) else jnp.float32

    # Weights are tiny; keep them f32 and pre-transposed (no in-kernel transpose).
    w1t = jnp.asarray(w1, jnp.float32).T               # (C, Ch)
    w2t = jnp.asarray(w2, jnp.float32).T               # (Ch, C)

    scoped_cap, num_tc = _chip_budget()
    # Input blocks are double-buffered; leave headroom for weights/output/scratch.
    max_block_bytes = max(1 << 20, (scoped_cap - (6 << 20)) // 2)
    if _max_block_bytes is not None:                    # test hook
        max_block_bytes = int(_max_block_bytes)
    target = min(target_block_bytes, max_block_bytes)

    per_sample_bytes = C * HW * itemsize

    # ---- batch tile nb: MiB-scale DMAs, >=2 steps per TC on multi-TC chips ----
    nb = max(1, min(N, target // max(per_sample_bytes, 1)))
    if num_tc > 1 and N >= 2 * num_tc:
        nb = min(nb, pl.cdiv(N, 2 * num_tc))
    if nb >= N:
        nb = N                                          # single block: exact size OK
    else:
        nb = min(N, _round_up(nb, 8))                   # clean (8,128) output tiles
        if nb >= N:
            nb = N

    # ---- spatial tile: only engaged when a full-HW block would blow VMEM ----
    hw_tile = HW
    if nb * C * HW * itemsize > max_block_bytes:
        max_hw = max_block_bytes // max(nb * C * itemsize, 1)
        hw_tile = max(128, (max_hw // 128) * 128)       # lane dim: multiple of 128
        while nb > 8 and nb * C * hw_tile * itemsize > max_block_bytes:
            nb -= 8                                     # rare: very large C
        if hw_tile >= HW:
            hw_tile = HW
    grid_hw = pl.cdiv(HW, hw_tile)
    masked = (HW % hw_tile) != 0

    grid_n = pl.cdiv(N, nb)
    n_pad = grid_n * nb        # output over-allocated; input is NOT padded/copied

    # ---- scoped VMEM sized from actual need, clamped to the per-gen budget ----
    block_bytes = nb * C * hw_tile * itemsize
    out_item = jnp.dtype(out_dtype).itemsize
    vmem_need = (2 * block_bytes                        # double-buffered input block
                 + 2 * 2 * C * Ch * 4                   # w1t + w2t (double-buffered)
                 + 2 * nb * C * out_item                # output block
                 + 2 * nb * C * 4                       # sum / max scratch
                 + (2 << 20))                           # slack
    vmem_limit = int(min(max(vmem_need, 32 << 20), scoped_cap))

    # Advisory cost estimate: memory-heavy, compute-light.
    cost = pl.CostEstimate(
        flops=int(2 * N * C * HW + 4 * N * (C * Ch + Ch * C)),
        transcendentals=int(N * C),
        bytes_accessed=int(N * C * HW * itemsize + 2 * C * Ch * 4 + N * C * out_item),
    )

    kernel = functools.partial(channel_attention_kernel,
                               hw_total=HW, hw_tile=hw_tile, masked=masked)

    out = pl.pallas_call(
        kernel,
        out_shape=jax.ShapeDtypeStruct((n_pad, C), out_dtype),
        grid_spec=pltpu.PrefetchScalarGridSpec(
            num_scalar_prefetch=0,
            grid=(grid_n, grid_hw),
            in_specs=[
                pl.BlockSpec((nb, C, hw_tile), lambda n, h: (n, 0, h)),
                pl.BlockSpec((C, Ch), lambda n, h: (0, 0)),
                pl.BlockSpec((Ch, C), lambda n, h: (0, 0)),
            ],
            out_specs=pl.BlockSpec((nb, C), lambda n, h: (n, 0)),
            scratch_shapes=[pltpu.VMEM((nb, C), jnp.float32),
                            pltpu.VMEM((nb, C), jnp.float32)],
        ),
        compiler_params=pltpu.CompilerParams(
            dimension_semantics=("parallel", "arbitrary"),
            vmem_limit_bytes=vmem_limit,
        ),
        cost_estimate=cost,
    )(x_flat, w1t, w2t)

    return out[:N].reshape(N, C, 1, 1)


def reference(x_nchw, w1, w2):
    xf = jnp.asarray(x_nchw, jnp.float32)
    avg = jnp.mean(xf, axis=(2, 3))                     # (N, C)
    mx = jnp.max(xf, axis=(2, 3))                       # (N, C)
    w1f = jnp.asarray(w1, jnp.float32)
    w2f = jnp.asarray(w2, jnp.float32)

    def fc(v):
        h = jnp.maximum(v @ w1f.T, 0.0)
        return h @ w2f.T

    return jax.nn.sigmoid(fc(avg) + fc(mx))[:, :, None, None]


if __name__ == "__main__":
    key = jax.random.PRNGKey(0)

    # Case 1: ChannelAttention(in_planes=64, ratio=16), f32, single-block path.
    N, C, H, W = 2, 64, 16, 16
    Ch = C // 16
    kx, k1, k2, key = jax.random.split(key, 4)
    x = jax.random.normal(kx, (N, C, H, W), dtype=jnp.float32)
    w1 = jax.random.normal(k1, (Ch, C), dtype=jnp.float32) * 0.1   # Conv2d(C,Ch,1).weight squeezed
    w2 = jax.random.normal(k2, (C, Ch), dtype=jnp.float32) * 0.1   # Conv2d(Ch,C,1).weight squeezed

    out = jax.block_until_ready(channel_attention(x, w1, w2))
    assert out.shape == (N, C, 1, 1)
    assert jnp.allclose(out, reference(x, w1, w2), atol=1e-5, rtol=1e-5), "mismatch (case 1)"

    # Case 2: bf16 activations streamed in native dtype, C=32, ratio=16.
    N2, C2, H2, W2 = 5, 32, 8, 8
    Ch2 = C2 // 16
    kx2, k12, k22, key = jax.random.split(key, 4)
    x2 = jax.random.normal(kx2, (N2, C2, H2, W2), dtype=jnp.bfloat16)
    w12 = jax.random.normal(k12, (Ch2, C2), dtype=jnp.float32) * 0.1
    w22 = jax.random.normal(k22, (C2, Ch2), dtype=jnp.float32) * 0.1

    out2 = jax.block_until_ready(channel_attention(x2, w12, w22))
    assert out2.shape == (N2, C2, 1, 1)
    assert jnp.allclose(jnp.asarray(out2, jnp.float32), reference(x2, w12, w22),
                        atol=2e-2, rtol=2e-2), "mismatch (case 2)"

    # Case 3: force multi batch-block (nb=8, N=10 -> padded output rows discarded)
    # and HW tiling with a ragged masked last tile (HW=400, hw_tile=128).
    N3, C3, H3, W3 = 10, 32, 20, 20
    Ch3 = C3 // 16
    kx3, k13, k23, key = jax.random.split(key, 4)
    x3 = jax.random.normal(kx3, (N3, C3, H3, W3), dtype=jnp.float32)
    w13 = jax.random.normal(k13, (Ch3, C3), dtype=jnp.float32) * 0.1
    w23 = jax.random.normal(k23, (C3, Ch3), dtype=jnp.float32) * 0.1

    out3 = jax.block_until_ready(
        channel_attention(x3, w13, w23, target_block_bytes=1, _max_block_bytes=48 * 1024))
    assert out3.shape == (N3, C3, 1, 1)
    assert jnp.allclose(out3, reference(x3, w13, w23), atol=1e-5, rtol=1e-5), "mismatch (case 3)"

    print("KERNEL_OK")
</pallas_src>

<mosaic_0001>
module attributes {stable_mosaic.version = 11 : i64} {
  func.func @channel_attention_kernel(%arg0: i32, %arg1: i32, %arg2: memref<2x64x256xf32, #tpu.memory_space<vmem>>, %arg3: memref<64x4xf32, #tpu.memory_space<vmem>>, %arg4: memref<4x64xf32, #tpu.memory_space<vmem>>, %arg5: memref<2x64xf32, #tpu.memory_space<vmem>>, %arg6: memref<2x64xf32, #tpu.memory_space<vmem>>, %arg7: memref<2x64xf32, #tpu.memory_space<vmem>>) attributes {dimension_semantics = [#tpu.dimension_semantics<parallel>, #tpu.dimension_semantics<arbitrary>], iteration_bounds = array<i64: 1, 1>, scalar_prefetch = 0 : i64, scratch_operands = 2 : i64, tpu.core_type = #tpu.core_type<tc>, window_params = [{transform_indices = @transform_0, window_bounds = array<i64: 2, 64, 256>}, {pipeline_mode = #tpu.pipeline_mode<synchronous>, transform_indices = @transform_1, window_bounds = array<i64: 64, 4>}, {pipeline_mode = #tpu.pipeline_mode<synchronous>, transform_indices = @transform_2, window_bounds = array<i64: 4, 64>}, {transform_indices = @transform_3, window_bounds = array<i64: 2, 64>}]} {
    %c0_i32 = arith.constant 0 : i32
    %0 = arith.cmpi eq, %arg1, %c0_i32 : i32
    %1 = arith.extui %0 : i1 to i32
    %c0_i32_0 = arith.constant 0 : i32
    %2 = arith.cmpi ne, %1, %c0_i32_0 : i32
    scf.if %2 {
      %cst_14 = arith.constant 0.000000e+00 : f32
      %15 = vector.broadcast %cst_14 : f32 to vector<2x64xf32>
      %c0_15 = arith.constant 0 : index
      %c0_16 = arith.constant 0 : index
      %16 = vector.load %arg6[%c0_15, %c0_16] : memref<2x64xf32, #tpu.memory_space<vmem>>, vector<2x64xf32>
      tpu.vector_store %arg6[%c0_15, %c0_16], %15 {strides = array<i32>} : memref<2x64xf32, #tpu.memory_space<vmem>>, vector<2x64xf32>,
      %cst_17 = arith.constant 0xFF800000 : f32
      %17 = vector.broadcast %cst_17 : f32 to vector<2x64xf32>
      %c0_18 = arith.constant 0 : index
      %c0_19 = arith.constant 0 : index
      %18 = vector.load %arg7[%c0_18, %c0_19] : memref<2x64xf32, #tpu.memory_space<vmem>>, vector<2x64xf32>
      tpu.vector_store %arg7[%c0_18, %c0_19], %17 {strides = array<i32>} : memref<2x64xf32, #tpu.memory_space<vmem>>, vector<2x64xf32>,
    } else {
    }
    %c0 = arith.constant 0 : index
    %c0_1 = arith.constant 0 : index
    %c0_2 = arith.constant 0 : index
    %3 = vector.load %arg2[%c0, %c0_1, %c0_2] : memref<2x64x256xf32, #tpu.memory_space<vmem>>, vector<2x64x256xf32>
    %c0_3 = arith.constant 0 : index
    %c0_4 = arith.constant 0 : index
    %4 = vector.load %arg6[%c0_3, %c0_4] : memref<2x64xf32, #tpu.memory_space<vmem>>, vector<2x64xf32>
    %cst = arith.constant dense<0.000000e+00> : vector<2x64xf32>
    %5 = vector.multi_reduction <add>, %3, %cst [2] : vector<2x64x256xf32> to vector<2x64xf32>
    %6 = arith.addf %4, %5 : vector<2x64xf32>
    %c0_5 = arith.constant 0 : index
    %c0_6 = arith.constant 0 : index
    %7 = vector.load %arg6[%c0_5, %c0_6] : memref<2x64xf32, #tpu.memory_space<vmem>>, vector<2x64xf32>
    tpu.vector_store %arg6[%c0_5, %c0_6], %6 {strides = array<i32>} : memref<2x64xf32, #tpu.memory_space<vmem>>, vector<2x64xf32>,
    %c0_7 = arith.constant 0 : index
    %c0_8 = arith.constant 0 : index
    %8 = vector.load %arg7[%c0_7, %c0_8] : memref<2x64xf32, #tpu.memory_space<vmem>>, vector<2x64xf32>
    %cst_9 = arith.constant dense<0xFF800000> : vector<2x64xf32>
    %9 = vector.multi_reduction <maximumf>, %3, %cst_9 [2] : vector<2x64x256xf32> to vector<2x64xf32>
    %10 = arith.maximumf %8, %9 : vector<2x64xf32>
    %c0_10 = arith.constant 0 : index
    %c0_11 = arith.constant 0 : index
    %11 = vector.load %arg7[%c0_10, %c0_11] : memref<2x64xf32, #tpu.memory_space<vmem>>, vector<2x64xf32>
    tpu.vector_store %arg7[%c0_10, %c0_11], %10 {strides = array<i32>} : memref<2x64xf32, #tpu.memory_space<vmem>>, vector<2x64xf32>,
    %c0_i32_12 = arith.constant 0 : i32
    %12 = arith.cmpi eq, %arg1, %c0_i32_12 : i32
    %13 = arith.extui %12 : i1 to i32
    %c0_i32_13 = arith.constant 0 : i32
    %14 = arith.cmpi ne, %13, %c0_i32_13 : i32
    scf.if %14 {
      %c0_14 = arith.constant 0 : index
      %c0_15 = arith.constant 0 : index
      %15 = vector.load %arg6[%c0_14, %c0_15] : memref<2x64xf32, #tpu.memory_space<vmem>>, vector<2x64xf32>
      %cst_16 = arith.constant 3.906250e-03 : f32
      %16 = vector.broadcast %cst_16 : f32 to vector<2x64xf32>
      %17 = arith.mulf %15, %16 : vector<2x64xf32>
      %c0_17 = arith.constant 0 : index
      %c0_18 = arith.constant 0 : index
      %18 = vector.load %arg7[%c0_17, %c0_18] : memref<2x64xf32, #tpu.memory_space<vmem>>, vector<2x64xf32>
      %19 = tpu.concatenate %17, %18 in 0 : vector<2x64xf32>, vector<2x64xf32> -> vector<4x64xf32>
      %c0_19 = arith.constant 0 : index
      %c0_20 = arith.constant 0 : index
      %20 = vector.load %arg3[%c0_19, %c0_20] : memref<64x4xf32, #tpu.memory_space<vmem>>, vector<64x4xf32>
      %cst_21 = arith.constant dense<0.000000e+00> : vector<4x4xf32>
      %21 = tpu.matmul %19, %20, %cst_21 {dimension_numbers = #tpu.dot_dimension_numbers<[1], [0], [0], [1], [0, 0, 1, 1], [], []>} : vector<4x64xf32>, vector<64x4xf32>, vector<4x4xf32> -> vector<4x4xf32>
      %cst_22 = arith.constant 0.000000e+00 : f32
      %22 = vector.broadcast %cst_22 : f32 to vector<4x4xf32>
      %23 = arith.maximumf %21, %22 : vector<4x4xf32>
      %c0_23 = arith.constant 0 : index
      %c0_24 = arith.constant 0 : index
      %24 = vector.load %arg4[%c0_23, %c0_24] : memref<4x64xf32, #tpu.memory_space<vmem>>, vector<4x64xf32>
      %cst_25 = arith.constant dense<0.000000e+00> : vector<4x64xf32>
      %25 = tpu.matmul %23, %24, %cst_25 {dimension_numbers = #tpu.dot_dimension_numbers<[1], [0], [0], [1], [0, 0, 1, 1], [], []>} : vector<4x4xf32>, vector<4x64xf32>, vector<4x64xf32> -> vector<4x64xf32>
      %26 = vector.extract_strided_slice %25 {offsets = [0, 0], sizes = [2, 64], strides = [1, 1]} : vector<4x64xf32> to vector<2x64xf32>
      %27 = vector.extract_strided_slice %25 {offsets = [2, 0], sizes = [2, 64], strides = [1, 1]} : vector<4x64xf32> to vector<2x64xf32>
      %28 = arith.addf %26, %27 : vector<2x64xf32>
      %29 = arith.negf %28 : vector<2x64xf32>
      %30 = math.exp %29 : vector<2x64xf32>
      %cst_26 = arith.constant 1.000000e+00 : f32
      %31 = vector.broadcast %cst_26 : f32 to vector<2x64xf32>
      %32 = arith.addf %31, %30 : vector<2x64xf32>
      %33 = arith.divf %31, %32 : vector<2x64xf32>
      %c0_27 = arith.constant 0 : index
      %c0_28 = arith.constant 0 : index
      %34 = vector.load %arg5[%c0_27, %c0_28] : memref<2x64xf32, #tpu.memory_space<vmem>>, vector<2x64xf32>
      tpu.vector_store %arg5[%c0_27, %c0_28], %33 {strides = array<i32>} : memref<2x64xf32, #tpu.memory_space<vmem>>, vector<2x64xf32>,
    } else {
    }
    return
  }
  func.func @transform_0(%arg0: i32, %arg1: i32) -> (i32, i32, i32) {
    %c0_i32 = arith.constant 0 : i32
    %c0_i32_0 = arith.constant 0 : i32
    return %arg0, %c0_i32, %arg1 : i32, i32, i32
  }
  func.func @transform_1(%arg0: i32, %arg1: i32) -> (i32, i32) {
    %c0_i32 = arith.constant 0 : i32
    %c0_i32_0 = arith.constant 0 : i32
    %c0_i32_1 = arith.constant 0 : i32
    return %c0_i32, %c0_i32_0 : i32, i32
  }
  func.func @transform_2(%arg0: i32, %arg1: i32) -> (i32, i32) {
    %c0_i32 = arith.constant 0 : i32
    %c0_i32_0 = arith.constant 0 : i32
    %c0_i32_1 = arith.constant 0 : i32
    return %c0_i32, %c0_i32_0 : i32, i32
  }
  func.func @transform_3(%arg0: i32, %arg1: i32) -> (i32, i32) {
    %c0_i32 = arith.constant 0 : i32
    %c0_i32_0 = arith.constant 0 : i32
    return %arg0, %c0_i32 : i32, i32
  }
}

</mosaic_0001>

<bundles_post_ra>
// kernel: tpu_custom_call.1
= control target key start
LH: loop header
LB: loop body
LE: loop exit
PB: predicated region body
PF: predicated region fallthrough
CT: control target
= control target key end

     0   :  { %8 = vsyncpa [#allocation5], 0  ;;  %s678_s0 = inlined_call_operand.hbm [shape: f32[2,64,256], index: 0, kind: input, shape index: {}]   ;;  %s679_s1 = inlined_call_operand.vmem [shape: f32[64,4], index: 1, kind: input, shape index: {}]   ;;  %s680_s2 = inlined_call_operand.vmem [shape: f32[4,64], index: 2, kind: input, shape index: {}]   ;;  %s681_s3 = inlined_call_operand.hbm [shape: f32[2,64], index: 3, kind: output, shape index: {}]  }
   0x1   :  { %9 = vsyncpa [#allocation6], 0  ;;  %s14_s14 = sshll.u32 %s678_s0, 4  ;;  %s466_s15 = smov [#allocation4]   ;;  %s15_s14 = int_to_ptr.hbm [resolvable:$true] %s14_s14 }
   0x2   :  { %s16_s16 = sshll.u32 %s466_s15, 4  ;;  %s467_s17 = smov 256   ;;  %s17_s16 = int_to_ptr.vmem [resolvable:$true] %s16_s16 }
   0x3   :  { %s468_s18 = smov 16  }
   0x4   :  { %22 = dma.hbm_to_vmem [thread:$0]  %s15_s14, 4096, %s17_s16, [#allocation5], %s467_s17, %s467_s17, %s468_s18  }
   0x5   :  { %462 = dma.done.wait [#allocation5], 4096  }
   0x6   :  { %463 = vsyncadd [#allocation5], 4294963200  ;;  %v54_v0 = vld [vmem:[#allocation4 + $0x80] sm:$0xff]  ;;  %v55_v1 = vld [vmem:[#allocation4 + $0x88] sm:$0xff]  ;;  %vm140_vm0 = vcmask 130112   ;;  %vm35_vm1 = vcmask 517120  }
   0x7   :  { %v38_v2 = vld [vmem:[#allocation4] sm:$0xff]  ;;  %v95_v3 = vadd.f32 %v55_v1, %v54_v0  ;;  %v39_v4 = vld [vmem:[#allocation4 + $0x8] sm:$0xff]  ;;  %v56_v7 = vld [vmem:[#allocation4 + $0x90] sm:$0xff]  ;;  %v212_v18 = vmax.f32 %v54_v0, %v55_v1  ;;  %v135_v0 = vlaneseq  ;;  %vm144_vm2 = vcmask 195712   ;;  %s390_s11 = sshll.u32 %s681_s3, 4  ;;  %s391_s11 = int_to_ptr.hbm [resolvable:$true] %s390_s11 }
   0x8   :  { %v188_v5 = vmax.f32 %v38_v2, %v39_v4  ;;  %v71_v6 = vadd.f32 %v39_v4, %v38_v2  ;;  %v57_v8 = vld [vmem:[#allocation4 + $0x98] sm:$0xff]  ;;  %v40_v9 = vld [vmem:[#allocation4 + $0x10] sm:$0xff]  ;;  %v42_v14 = vld [vmem:[#allocation4 + $0x20] sm:$0xff]  ;;  %vm148_vm3 = vcmask 261312   ;;  %vm152_vm4 = vcmask 326912  }
   0x9   :  { %96 = vadd.xlane.f32.xlu1 %v95_v3  ;;  %v41_v10 = vld [vmem:[#allocation4 + $0x18] sm:$0xff]  ;;  %v98_v11 = vadd.f32 %v57_v8, %v56_v7  ;;  %v43_v15 = vld [vmem:[#allocation4 + $0x28] sm:$0xff]  ;;  %v215_v16 = vmax.f32 %v56_v7, %v57_v8  ;;  %v58_v19 = vld [vmem:[#allocation4 + $0xa0] sm:$0xff]  ;;  %v499_v4 = vand.u32 127, %v135_v0  ;;  %vm156_vm5 = vcmask 392512  }
   0xa   :  { %189 = vmax.xlane.f32.xlu2 %v188_v5  ;;  %72 = vadd.xlane.f32.xlu0 %v71_v6  ;;  %v191_v12 = vmax.f32 %v40_v9, %v41_v10  ;;  %v74_v13 = vadd.f32 %v41_v10, %v40_v9  ;;  %v77_v17 = vadd.f32 %v43_v15, %v42_v14  ;;  %v59_v20 = vld [vmem:[#allocation4 + $0xa8] sm:$0xff]  ;;  %v60_v24 = vld [vmem:[#allocation4 + $0xb0] sm:$0xff]  ;;  %v61_v25 = vld [vmem:[#allocation4 + $0xb8] sm:$0xff]  ;;  %vm160_vm6 = vcmask 458112  }
   0xb   :  { %v194_v21 = vmax.f32 %v42_v14, %v43_v15  ;;  %v218_v22 = vmax.f32 %v58_v19, %v59_v20  ;;  %v101_v23 = vadd.f32 %v59_v20, %v58_v19  ;;  %v44_v26 = vld [vmem:[#allocation4 + $0x30] sm:$0xff]  ;;  %v45_v27 = vld [vmem:[#allocation4 + $0x38] sm:$0xff]  ;;  %v104_v28 = vadd.f32 %v61_v25, %v60_v24  ;;  %v46_v31 = vld [vmem:[#allocation4 + $0x40] sm:$0xff] }
   0xc   :  { %v197_v29 = vmax.f32 %v44_v26, %v45_v27  ;;  %v80_v30 = vadd.f32 %v45_v27, %v44_v26  ;;  %v47_v32 = vld [vmem:[#allocation4 + $0x48] sm:$0xff]  ;;  %v62_v33 = vld [vmem:[#allocation4 + $0xc0] sm:$0xff]  ;;  %v221_v37 = vmax.f32 %v60_v24, %v61_v25  ;;  %v48_v38 = vld [vmem:[#allocation4 + $0x50] sm:$0xff]  ;;  %v502_v5 = vadd.s32 4294967288, %v499_v4 }
   0xd   :  { %v63_v34 = vld [vmem:[#allocation4 + $0xc8] sm:$0xff]  ;;  %v83_v35 = vadd.f32 %v47_v32, %v46_v31  ;;  %v49_v39 = vld [vmem:[#allocation4 + $0x58] sm:$0xff]  ;;  %v200_v42 = vmax.f32 %v46_v31, %v47_v32  ;;  %v64_v43 = vld [vmem:[#allocation4 + $0xd0] sm:$0xff]  ;;  %v470_v25 = vmov -inf   ;;  %vm164_vm7 = vcmask 523712  }
   0xe   :  { %v107_v36 = vadd.f32 %v63_v34, %v62_v33  ;;  %v224_v40 = vmax.f32 %v62_v33, %v63_v34  ;;  %v86_v41 = vadd.f32 %v49_v39, %v48_v38  ;;  %v65_v44 = vld [vmem:[#allocation4 + $0xd8] sm:$0xff]  ;;  %v203_v45 = vmax.f32 %v48_v38, %v49_v39  ;;  %v66_v48 = vld [vmem:[#allocation4 + $0xe0] sm:$0xff]  ;;  %v67_v49 = vld [vmem:[#allocation4 + $0xe8] sm:$0xff]  ;;  %37 = vst.msk [vmem:[#allocation3] sm:$0x3] %vm35_vm1, %v470_v25 }
   0xf   :  { %v227_v46 = vmax.f32 %v64_v43, %v65_v44  ;;  %v110_v47 = vadd.f32 %v65_v44, %v64_v43  ;;  %v50_v50 = vld [vmem:[#allocation4 + $0x60] sm:$0xff]  ;;  %v51_v51 = vld [vmem:[#allocation4 + $0x68] sm:$0xff]  ;;  %v113_v52 = vadd.f32 %v67_v49, %v66_v48  ;;  %v52_v55 = vld [vmem:[#allocation4 + $0x70] sm:$0xff]  ;;  %v230_v61 = vmax.f32 %v66_v48, %v67_v49 }
  0x10   :  { %v206_v53 = vmax.f32 %v50_v50, %v51_v51  ;;  %v89_v54 = vadd.f32 %v51_v51, %v50_v50  ;;  %v53_v56 = vld [vmem:[#allocation4 + $0x78] sm:$0xff]  ;;  %v68_v57 = vld [vmem:[#allocation4 + $0xf0] sm:$0xff]  ;;  %v302_v31 = vld [vmem:[%s679_s1 + $0x28] sm:$0xff]  ;;  %v571_v39 = vadd.s32 4294967280, %v499_v4  ;;  %v584_v44 = vadd.s32 4294967264, %v499_v4 }
  0x11   :  { %99 = vadd.xlane.f32.xlu1 %v98_v11  ;;  %v69_v58 = vld [vmem:[#allocation4 + $0xf8] sm:$0xff]  ;;  %v92_v59 = vadd.f32 %v53_v56, %v52_v55  ;;  %v209_v63 = vmax.f32 %v52_v55, %v53_v56  ;;  %v298_v38 = vld [vmem:[%s679_s1 + $0x8] sm:$0xff]  ;;  %vm181_vm8 = vcmask 1041409   ;;  %vm295_vm9 = vcmask 1041408  }
  0x12   :  { %192 = vmax.xlane.f32.xlu2 %v191_v12  ;;  %75 = vadd.xlane.f32.xlu0 %v74_v13  ;;  %v116_v60 = vadd.f32 %v69_v58, %v68_v57  ;;  %v233_v62 = vmax.f32 %v68_v57, %v69_v58  ;;  %v301_v33 = vld [vmem:[%s679_s1 + $0x20] sm:$0xff]  ;;  %vm305_vm10 = vcmask 523264   ;;  %vm335_vm11 = vcmask 1043456  }
  0x13   :  { %vm331_vm12 = vcmask 31744  }
  0x19   :  { %216 = vmax.xlane.f32.xlu1 %v215_v16 }
  0x1a   :  { %78 = vadd.xlane.f32.xlu2 %v77_v17  ;;  %213 = vmax.xlane.f32.xlu0 %v212_v18 }
  0x21   :  { %195 = vmax.xlane.f32.xlu1 %v194_v21  ;;  %v469_v21 = vmov 0.0  }
  0x22   :  { %219 = vmax.xlane.f32.xlu2 %v218_v22  ;;  %102 = vadd.xlane.f32.xlu0 %v101_v23  ;;  %36 = vst.msk [vmem:[#allocation2] sm:$0x3] %vm35_vm1, %v469_v21 }
  0x29   :  { %105 = vadd.xlane.f32.xlu1 %v104_v28 }
  0x2a   :  { %198 = vmax.xlane.f32.xlu2 %v197_v29  ;;  %81 = vadd.xlane.f32.xlu0 %v80_v30  ;;  %v304_v29 = vld [vmem:[%s679_s1 + $0x38] sm:$0xff]  ;;  %v303_v30 = vld [vmem:[%s679_s1 + $0x30] sm:$0xff] }
  0x2b   :  { %317 = vmatpush.msra.mxu0 %v304_v29 }
  0x2d   :  { %318 = vmatpush.msra.mxu0 %v303_v30 }
  0x2f   :  { %319 = vmatpush.msra.mxu0 %v302_v31 }
  0x31   :  { %84 = vadd.xlane.f32.xlu1 %v83_v35  ;;  %320 = vmatpush.msra.mxu0 %v301_v33 }
  0x32   :  { %108 = vadd.xlane.f32.xlu2 %v107_v36  ;;  %222 = vmax.xlane.f32.xlu0 %v221_v37  ;;  %v300_v36 = vld [vmem:[%s679_s1 + $0x18] sm:$0xff]  ;;  %v299_v37 = vld [vmem:[%s679_s1 + $0x10] sm:$0xff] }
  0x33   :  { %321 = vmatpush.msra.mxu0 %v300_v36 }
  0x35   :  { %322 = vmatpush.msra.mxu0 %v299_v37 }
  0x37   :  { %323 = vmatpush.msra.mxu0 %v298_v38 }
  0x39   :  { %225 = vmax.xlane.f32.xlu1 %v224_v40  ;;  %v574_v40 = vadd.s32 4294967272, %v499_v4 }
  0x3a   :  { %87 = vadd.xlane.f32.xlu2 %v86_v41  ;;  %201 = vmax.xlane.f32.xlu0 %v200_v42  ;;  %v297_v41 = vld [vmem:[%s679_s1] sm:$0xff] }
  0x3b   :  { %324 = vmatpush.msra.mxu0 %v297_v41 }
  0x41   :  { %204 = vmax.xlane.f32.xlu1 %v203_v45 }
  0x42   :  { %228 = vmax.xlane.f32.xlu2 %v227_v46  ;;  %111 = vadd.xlane.f32.xlu0 %v110_v47  ;;  %v587_v46 = vadd.s32 4294967256, %v499_v4 }
  0x49   :  { %114 = vadd.xlane.f32.xlu1 %v113_v52  ;;  %v598_v52 = vadd.s32 4294967248, %v499_v4 }
  0x4a   :  { %207 = vmax.xlane.f32.xlu2 %v206_v53  ;;  %90 = vadd.xlane.f32.xlu0 %v89_v54 }
  0x51   :  { %93 = vadd.xlane.f32.xlu1 %v92_v59 }
  0x52   :  { %117 = vadd.xlane.f32.xlu2 %v116_v60  ;;  %231 = vmax.xlane.f32.xlu0 %v230_v61 }
  0x59   :  { %234 = vmax.xlane.f32.xlu1 %v233_v62  ;;  %v162_v62 = vadd.s32 4294967240, %v499_v4 }
  0x5a   :  { %210 = vmax.xlane.f32.xlu0 %v209_v63 }
  0x7c   :  { %v495_v1 = vpop.xlane.xlu1 %96 }
  0x7d   :  { %v190_v2 = vpop.xlane.xlu2 %189  ;;  %v497_v3 = vpop.xlane.xlu0 %72  ;;  %v166_v49 = vperm.slane %v495_v1, %v499_v4 }
  0x7e   :  { %v252_v6 = vperm.slane %v190_v2, %v499_v4  ;;  %v137_v50 = vperm.slane %v497_v3, %v499_v4 }
  0x84   :  { %v505_v7 = vpop.xlane.xlu1 %99 }
  0x85   :  { %v193_v8 = vpop.xlane.xlu2 %192  ;;  %v507_v9 = vpop.xlane.xlu0 %75  ;;  %v167_v42 = vperm.slane %v505_v7, %v502_v5 }
  0x86   :  { %v253_v10 = vperm.slane %v193_v8, %v502_v5  ;;  %v139_v43 = vperm.slane %v507_v9, %v502_v5 }
  0x87   :  { %v168_v55 = vsel %vm140_vm0, %v167_v42, %v166_v49  ;;  %v187_v49 = vld [vmem:[#allocation3] sm:$0x3] }
  0x88   :  { %v511_v11 = vsel %vm140_vm0, %v253_v10, %v252_v6  ;;  %v141_v56 = vsel %vm140_vm0, %v139_v43, %v137_v50 }
  0x8c   :  { %v513_v12 = vpop.xlane.xlu1 %216 }
  0x8d   :  { %v515_v13 = vpop.xlane.xlu2 %78  ;;  %v517_v14 = vpop.xlane.xlu0 %213  ;;  %v268_v59 = vperm.slane %v513_v12, %v502_v5 }
  0x8e   :  { %v143_v51 = vperm.slane %v515_v13, %v571_v39  ;;  %v267_v6 = vperm.slane %v517_v14, %v499_v4 }
  0x90   :  { %v145_v63 = vsel %vm144_vm2, %v143_v51, %v141_v56  ;;  %v269_v33 = vsel %vm140_vm0, %v268_v59, %v267_v6 }
  0x94   :  { %v519_v15 = vpop.xlane.xlu1 %195 }
  0x95   :  { %v521_v16 = vpop.xlane.xlu2 %219  ;;  %v523_v17 = vpop.xlane.xlu0 %102 }
  0x96   :  { %v169_v53 = vperm.slane %v523_v17, %v571_v39  ;;  %v270_v10 = vperm.slane %v521_v16, %v571_v39 }
  0x98   :  { %v170_v2 = vsel %vm144_vm2, %v169_v53, %v168_v55  ;;  %v271_v36 = vsel %vm144_vm2, %v270_v10, %v269_v33 }
  0x9c   :  { %v525_v18 = vpop.xlane.xlu1 %105 }
  0x9d   :  { %v527_v19 = vpop.xlane.xlu2 %198  ;;  %v529_v20 = vpop.xlane.xlu0 %81  ;;  %v171_v57 = vperm.slane %v525_v18, %v574_v40 }
  0x9e   :  { %v147_v54 = vperm.slane %v529_v20, %v574_v40  ;;  %v257_v29 = vperm.slane %v527_v19, %v574_v40 }
  0x9f   :  { %v172_v7 = vsel %vm148_vm3, %v171_v57, %v170_v2 }
  0xa0   :  { %v149_v3 = vsel %vm148_vm3, %v147_v54, %v145_v63 }
  0xa4   :  { %v532_v22 = vpop.xlane.xlu1 %84 }
  0xa5   :  { %v534_v23 = vpop.xlane.xlu2 %108  ;;  %v536_v24 = vpop.xlane.xlu0 %222  ;;  %v151_v58 = vperm.slane %v532_v22, %v584_v44  ;;  %v255_v22 = vperm.slane %v519_v15, %v571_v39 }
  0xa6   :  { %v173_v60 = vperm.slane %v534_v23, %v584_v44  ;;  %v272_v23 = vperm.slane %v536_v24, %v574_v40 }
  0xa7   :  { %v153_v8 = vsel %vm152_vm4, %v151_v58, %v149_v3  ;;  %v256_v38 = vsel %vm144_vm2, %v255_v22, %v511_v11  ;;  %v330_v58 = vld [vmem:[%s680_s2] sm:$0xf]  ;;  %s471_s2 = smov [#allocation7]  }
  0xa8   :  { %v174_v12 = vsel %vm152_vm4, %v173_v60, %v172_v7  ;;  %v273_v39 = vsel %vm148_vm3, %v272_v23, %v271_v36  ;;  %401 = vmatpush.msk.msra.mxu1 %vm335_vm11, %v330_v58  ;;  %s388_s8 = sshll.u32 %s471_s2, 4  ;;  %s389_s8 = int_to_ptr.vmem [resolvable:$true] %s388_s8 }
  0xac   :  { %v539_v26 = vpop.xlane.xlu1 %225 }
  0xad   :  { %v541_v27 = vpop.xlane.xlu2 %87  ;;  %v543_v28 = vpop.xlane.xlu0 %201  ;;  %v274_v30 = vperm.slane %v539_v26, %v584_v44 }
  0xae   :  { %v155_v61 = vperm.slane %v541_v27, %v587_v46  ;;  %v70_v27 = vld [vmem:[#allocation2] sm:$0x3]  ;;  %v259_v15 = vperm.slane %v543_v28, %v584_v44 }
  0xaf   :  { %v275_v40 = vsel %vm152_vm4, %v274_v30, %v273_v39 }
  0xb0   :  { %v157_v13 = vsel %vm156_vm5, %v155_v61, %v153_v8 }
  0xb4   :  { %v554_v32 = vpop.xlane.xlu1 %204 }
  0xb5   :  { %v559_v34 = vpop.xlane.xlu2 %228  ;;  %v112_v35 = vpop.xlane.xlu0 %111  ;;  %v261_v19 = vperm.slane %v554_v32, %v587_v46 }
  0xb6   :  { %v175_v0 = vperm.slane %v112_v35, %v587_v46  ;;  %v276_v24 = vperm.slane %v559_v34, %v587_v46  ;;  %v258_v34 = vsel %vm148_vm3, %v257_v29, %v256_v38 }
  0xb7   :  { %v260_v32 = vsel %vm152_vm4, %v259_v15, %v258_v34 }
  0xb8   :  { %v176_v21 = vsel %vm156_vm5, %v175_v0, %v174_v12  ;;  %v277_v42 = vsel %vm156_vm5, %v276_v24, %v275_v40  ;;  %v262_v11 = vsel %vm156_vm5, %v261_v19, %v260_v32 }
  0xbc   :  { %v115_v45 = vpop.xlane.xlu1 %114 }
  0xbd   :  { %v589_v47 = vpop.xlane.xlu2 %207  ;;  %v91_v48 = vpop.xlane.xlu0 %90  ;;  %v177_v5 = vperm.slane %v115_v45, %v598_v52 }
  0xbe   :  { %v159_v1 = vperm.slane %v91_v48, %v598_v52  ;;  %v263_v28 = vperm.slane %v589_v47, %v598_v52 }
  0xbf   :  { %v178_v16 = vsel %vm160_vm6, %v177_v5, %v176_v21 }
  0xc0   :  { %v161_v4 = vsel %vm160_vm6, %v159_v1, %v157_v13  ;;  %v264_v47 = vsel %vm160_vm6, %v263_v28, %v262_v11 }
  0xc4   :  { %v94_v9 = vpop.xlane.xlu1 %93 }
  0xc5   :  { %v163_v17 = vperm.slane %v94_v9, %v162_v62  ;;  %v118_v18 = vpop.xlane.xlu2 %117  ;;  %v232_v20 = vpop.xlane.xlu0 %231 }
  0xc6   :  { %v179_v14 = vperm.slane %v118_v18, %v162_v62  ;;  %v278_v26 = vperm.slane %v232_v20, %v598_v52 }
  0xc7   :  { %v165_v25 = vsel %vm164_vm7, %v163_v17, %v161_v4 }
  0xc8   :  { %v180_v31 = vsel %vm164_vm7, %v179_v14, %v178_v16  ;;  %v279_v45 = vsel %vm160_vm6, %v278_v26, %v277_v42 }
  0xc9   :  { %v182_v35 = vsel %vm181_vm8, %v180_v31, %v165_v25 }
  0xca   :  { %v184_v37 = vadd.f32 %v182_v35, %v70_v27 }
  0xcc   :  { %186 = vst.msk [vmem:[#allocation2] sm:$0x3] %vm35_vm1, %v184_v37  ;;  %v235_v41 = vpop.xlane.xlu1 %234 }
  0xcd   :  { %v280_v43 = vperm.slane %v235_v41, %v162_v62  ;;  %v211_v44 = vpop.xlane.xlu0 %210 }
  0xce   :  { %v265_v46 = vperm.slane %v211_v44, %v162_v62 }
  0xcf   :  { %v281_v48 = vsel %vm164_vm7, %v280_v43, %v279_v45 }
  0xd0   :  { %v266_v50 = vsel %vm164_vm7, %v265_v46, %v264_v47 }
  0xd1   :  { %v282_v51 = vsel %vm181_vm8, %v281_v48, %v266_v50 }
  0xd2   :  { %v284_v52 = vmax.f32 %v187_v49, %v282_v51 }
  0xd3   :  { %v289_v53 = vld [vmem:[#allocation2] sm:$0x3] }
  0xd4   :  { %285 = vst.msk [vmem:[#allocation3] sm:$0x3] %vm35_vm1, %v284_v52  ;;  %v290_v55 = vmul.f32 0.00390625, %v289_v53 }
  0xdb   :  { %v291_v54 = vld [vmem:[#allocation3] sm:$0x3] }
  0xdc   :  { %v293_v56 = vrot.slane %v291_v54, 6 }
  0xde   :  { %v296_v57 = vsel %vm295_vm9, %v290_v55, %v293_v56 }
  0xdf   :  { %400 = vmatmul.msk.f32.vlgmr.msra.gmra.mxu0 %vm305_vm10, %v296_v57 }
 0x15c   :  { %v326_v59 = vpop.f32.mrf.mxu0 }
 0x15d   :  { %v329_v60 = vmax.f32 %v326_v59, 0.0 }
 0x15f   :  { %402 = vmatmul.msk.f32.vlgmr.msra.gmra.mxu1 %vm331_vm12, %v329_v60 }
 0x1dc   :  { %v356_v61 = vpop.f32.mrf.mxu1 }
 0x1dd   :  { %v360_v62 = vrot.slane %v356_v61, 2 }
 0x1df   :  { %v362_v63 = vadd.f32 %v360_v62, %v356_v61 }
 0x1e1   :  { %v403_v0 = vmul.f32 -1.442695, %v362_v63 }
 0x1e3   :  { %410 = vpow2.f32 %v403_v0 }
 0x1e9   :  { %v411_v1 = vpop.eup %410 }
 0x1ea   :  { %v366_v2 = vadd.f32 1.0, %v411_v1 }
 0x1ec   :  { %412 = vrcp.f32 %v366_v2  ;;  %v378_v7 = vand.u32 2147483648, %v366_v2  ;;  %v376_v9 = vand.u32 2147483647, %v366_v2  ;;  %vm372_vm14 = vweird.f32 %v366_v2 }
 0x1ee   :  { %v379_v12 = vor.u32 1.1754944e-38, %v378_v7  ;;  %vm377_vm0 = vcmp.eq.f32.partialorder %v376_v9, 8.507059e+37 }
 0x1f2   :  { %v413_v3 = vpop.eup %412 }
 0x1f3   :  { %v368_v5 = vmul.f32 %v413_v3, %v366_v2  ;;  %vm373_vm13 = vweird.f32 %v413_v3 }
 0x1f4   :  { %vm374_vm15 = vmor %vm372_vm14, %vm373_vm13 }
 0x1f5   :  { %v369_v6 = vsub.f32 1.0, %v368_v5 }
 0x1f7   :  { %v370_v8 = vmul.f32 %v413_v3, %v369_v6 }
 0x1f9   :  { %v371_v10 = vadd.f32 %v413_v3, %v370_v8 }
 0x1fb   :  { %v375_v13 = vsel %vm374_vm15, %v413_v3, %v371_v10 }
 0x1fc   :  { %v380_v17 = vsel %vm377_vm0, %v379_v12, %v375_v13 }
 0x1fd   :  { %382 = vst.msk [vmem:[#allocation7] sm:$0x3] %vm35_vm1, %v380_v17 }
 0x1fe   :  { %393 = dma.vmem_to_hbm [thread:$0]  %s389_s8, 32, %s391_s11, [#allocation6]  }
 0x1ff   :  { %464 = dma.done.wait [#allocation6], 32  }
 0x200   :  { %465 = vsyncadd [#allocation6], 4294967264 }
 0x201   :  { %398 = vsyncpa [#allocation5], 1 }
 0x202   :  { %399 = vsyncpa [#allocation6], 1 }

</bundles_post_ra>
